<compile_context>
chip_gen: v5e
topology: v5e:2x2
jax: 0.10.0
libtpu: 0.0.40
codegen_flags: <defaults>
</compile_context>

<pallas_src>
import functools

import jax
import jax.numpy as jnp
from jax import lax
from jax.experimental import pallas as pl
from jax.experimental.pallas import tpu as pltpu

IMG_SIZE = 400      # in_features of first Linear
HIDDEN_SIZE = 128   # hidden width / BatchNorm1d features
CLASS_SIZE = 90     # logits
CLASS_PAD = 128     # lane-dense padded logits width (sliced back to 90)
BN_EPS = 1e-5

_VMEM_LIMIT = 32 * 1024 * 1024   # safe scoped-VMEM budget on v5e / v6e / v7x


def _round_up(x, m):
    return (x + m - 1) // m * m


# ---------- pass 1: h = x @ W1 + b1,  accumulate per-feature sum / sumsq ----------
def _fc1_stats_kernel(valid_rows, tile_rows,
                      x_ref, w1_ref, b1_ref,
                      h_ref, sum_ref, sq_ref):
    i = pl.program_id(0)

    @pl.when(i == 0)
    def _():
        sum_ref[...] = jnp.zeros_like(sum_ref)
        sq_ref[...] = jnp.zeros_like(sq_ref)

    # bf16 inputs, f32 accumulation on the MXU.
    h = jnp.dot(x_ref[...], w1_ref[...], preferred_element_type=jnp.float32)
    h = h + b1_ref[...]
    h_ref[...] = h

    # Mask padded batch rows out of the training-mode BN statistics.
    row = i * tile_rows + lax.broadcasted_iota(jnp.int32, (tile_rows, 1), 0)
    hm = jnp.where(row < valid_rows, h, 0.0)
    sum_ref[...] += jnp.sum(hm, axis=0, keepdims=True)
    sq_ref[...] += jnp.sum(hm * hm, axis=0, keepdims=True)


# ---------- pass 2: BN affine + ReLU + Linear(128 -> 128-padded) + ReLU ----------
def _fc2_kernel(h_ref, scale_ref, shift_ref, w2_ref, b2_ref, o_ref):
    a = h_ref[...] * scale_ref[...] + shift_ref[...]       # BatchNorm1d (folded affine)
    a = jnp.maximum(a, 0.0)                                 # ReLU
    y = jnp.dot(a.astype(jnp.bfloat16), w2_ref[...],
                preferred_element_type=jnp.float32) + b2_ref[...]
    o_ref[...] = jnp.maximum(y, 0.0)                        # ReLU


def full_connected_forward(x, w1, b1, gamma, beta, w2, b2, *, tile_rows=None):
    B = x.shape[0]
    assert x.shape[1] == IMG_SIZE

    if tile_rows is None:
        # x tile (bf16) = tile_rows * 800 B; x2 buffers << 32 MiB on every generation,
        # while amortizing the ~0.35 us per-grid-step overhead and filling the MXU.
        tile_rows = 1024
    tile_rows = min(tile_rows, _round_up(B, 8))
    B_pad = _round_up(B, tile_rows)
    n_tiles = B_pad // tile_rows

    # bf16 for the dominant HBM stream (x) and the weights; biases / BN stay f32.
    xb = x.astype(jnp.bfloat16)
    if B_pad != B:
        xb = jnp.pad(xb, ((0, B_pad - B), (0, 0)))
    w1b = w1.astype(jnp.bfloat16)

    # Pad logits 90 -> 128 for lane-dense output stores; padded columns are zero.
    w2b = jnp.pad(w2, ((0, 0), (0, CLASS_PAD - CLASS_SIZE))).astype(jnp.bfloat16)
    b2p = jnp.pad(b2, ((0, 0), (0, CLASS_PAD - CLASS_SIZE)))

    cost1 = pl.CostEstimate(
        flops=2 * B_pad * IMG_SIZE * HIDDEN_SIZE,
        transcendentals=0,
        bytes_accessed=(B_pad * IMG_SIZE * 2 + IMG_SIZE * HIDDEN_SIZE * 2
                        + B_pad * HIDDEN_SIZE * 4 + 3 * HIDDEN_SIZE * 4),
    )
    h, fsum, fsq = pl.pallas_call(
        functools.partial(_fc1_stats_kernel, B, tile_rows),
        grid=(n_tiles,),
        in_specs=[
            pl.BlockSpec((tile_rows, IMG_SIZE), lambda i: (i, 0)),     # x tile
            pl.BlockSpec((IMG_SIZE, HIDDEN_SIZE), lambda i: (0, 0)),   # W1 (resident)
            pl.BlockSpec((1, HIDDEN_SIZE), lambda i: (0, 0)),          # b1
        ],
        out_specs=[
            pl.BlockSpec((tile_rows, HIDDEN_SIZE), lambda i: (i, 0)),  # h tile
            pl.BlockSpec((1, HIDDEN_SIZE), lambda i: (0, 0)),          # sum  (accumulator)
            pl.BlockSpec((1, HIDDEN_SIZE), lambda i: (0, 0)),          # sumsq (accumulator)
        ],
        out_shape=[
            jax.ShapeDtypeStruct((B_pad, HIDDEN_SIZE), jnp.float32),
            jax.ShapeDtypeStruct((1, HIDDEN_SIZE), jnp.float32),
            jax.ShapeDtypeStruct((1, HIDDEN_SIZE), jnp.float32),
        ],
        compiler_params=pltpu.CompilerParams(
            dimension_semantics=("arbitrary",),     # batch axis carries the BN-stat accumulator
            vmem_limit_bytes=_VMEM_LIMIT),
        cost_estimate=cost1,
    )(xb, w1b, b1)

    # Fold training-mode BN (biased batch variance) into a per-feature affine.
    # O(HIDDEN_SIZE) work only — not batch-sized compute hoisting.
    mean = fsum / B
    var = fsq / B - mean * mean
    scale = gamma * lax.rsqrt(var + BN_EPS)
    shift = beta - mean * scale

    cost2 = pl.CostEstimate(
        flops=2 * B_pad * HIDDEN_SIZE * CLASS_PAD + 4 * B_pad * HIDDEN_SIZE,
        transcendentals=0,
        bytes_accessed=(B_pad * HIDDEN_SIZE * 4 + HIDDEN_SIZE * CLASS_PAD * 2
                        + B_pad * CLASS_PAD * 4 + 3 * HIDDEN_SIZE * 4),
    )
    out_pad = pl.pallas_call(
        _fc2_kernel,
        grid=(n_tiles,),
        in_specs=[
            pl.BlockSpec((tile_rows, HIDDEN_SIZE), lambda i: (i, 0)),  # h tile
            pl.BlockSpec((1, HIDDEN_SIZE), lambda i: (0, 0)),          # BN scale
            pl.BlockSpec((1, HIDDEN_SIZE), lambda i: (0, 0)),          # BN shift
            pl.BlockSpec((HIDDEN_SIZE, CLASS_PAD), lambda i: (0, 0)),  # W2 (padded)
            pl.BlockSpec((1, CLASS_PAD), lambda i: (0, 0)),            # b2 (padded)
        ],
        out_specs=pl.BlockSpec((tile_rows, CLASS_PAD), lambda i: (i, 0)),
        out_shape=jax.ShapeDtypeStruct((B_pad, CLASS_PAD), jnp.float32),
        compiler_params=pltpu.CompilerParams(
            dimension_semantics=("parallel",),      # v7x: shard batch tiles across both TCs
            vmem_limit_bytes=_VMEM_LIMIT),
        cost_estimate=cost2,
    )(h, scale, shift, w2b, b2p)

    return out_pad[:B, :CLASS_SIZE]


def init_params(key):
    """PyTorch-style init: Linear U[-1/sqrt(fan_in), +], BN weight=1 / bias=0."""
    k1, k2, k3, k4 = jax.random.split(key, 4)
    bound1 = 1.0 / jnp.sqrt(IMG_SIZE)
    bound2 = 1.0 / jnp.sqrt(HIDDEN_SIZE)
    w1 = jax.random.uniform(k1, (IMG_SIZE, HIDDEN_SIZE), jnp.float32, -bound1, bound1)
    b1 = jax.random.uniform(k2, (1, HIDDEN_SIZE), jnp.float32, -bound1, bound1)
    w2 = jax.random.uniform(k3, (HIDDEN_SIZE, CLASS_SIZE), jnp.float32, -bound2, bound2)
    b2 = jax.random.uniform(k4, (1, CLASS_SIZE), jnp.float32, -bound2, bound2)
    gamma = jnp.ones((1, HIDDEN_SIZE), jnp.float32)
    beta = jnp.zeros((1, HIDDEN_SIZE), jnp.float32)
    return w1, b1, gamma, beta, w2, b2


def reference_forward_f32(x, w1, b1, gamma, beta, w2, b2):
    """Pure-f32 reference with the original module's semantics."""
    h = x @ w1 + b1
    mean = jnp.mean(h, axis=0, keepdims=True)
    var = jnp.mean((h - mean) ** 2, axis=0, keepdims=True)
    a = jnp.maximum((h - mean) * lax.rsqrt(var + BN_EPS) * gamma + beta, 0.0)
    return jnp.maximum(a @ w2 + b2, 0.0)


def reference_forward_matched(x, w1, b1, gamma, beta, w2, b2):
    """Reference with the kernel's bf16-input / f32-accumulation matmul precision."""
    h = jnp.dot(x.astype(jnp.bfloat16), w1.astype(jnp.bfloat16),
                preferred_element_type=jnp.float32) + b1
    mean = jnp.mean(h, axis=0, keepdims=True)
    var = jnp.mean(h * h, axis=0, keepdims=True) - mean * mean
    scale = gamma * lax.rsqrt(var + BN_EPS)
    shift = beta - mean * scale
    a = jnp.maximum(h * scale + shift, 0.0)
    y = jnp.dot(a.astype(jnp.bfloat16), w2.astype(jnp.bfloat16),
                preferred_element_type=jnp.float32) + b2
    return jnp.maximum(y, 0.0)


if __name__ == "__main__":
    key = jax.random.PRNGKey(0)
    kx, kx2, kp, kg, kb = jax.random.split(key, 5)

    w1, b1, gamma, beta, w2, b2 = init_params(kp)
    # Perturb BN affine away from the (1, 0) default so that code path is exercised.
    gamma = gamma + 0.1 * jax.random.normal(kg, gamma.shape, jnp.float32)
    beta = beta + 0.1 * jax.random.normal(kb, beta.shape, jnp.float32)
    params = (w1, b1, gamma, beta, w2, b2)

    # Small batch consistent with the module's BATCH_SIZE = 32.
    x = jax.random.normal(kx, (32, IMG_SIZE), jnp.float32)
    out = full_connected_forward(x, *params)
    jax.block_until_ready(out)
    assert out.shape == (32, CLASS_SIZE)
    assert jnp.allclose(out, reference_forward_matched(x, *params), atol=2e-3, rtol=2e-3), \
        "mismatch vs bf16-matched reference"
    assert jnp.allclose(out, reference_forward_f32(x, *params), atol=1e-1, rtol=1e-1), \
        "mismatch vs f32 reference"

    # Ragged batch: exercises multi-tile grid, the BN-stat accumulator across tiles,
    # and masking of padded batch rows.
    x2 = jax.random.normal(kx2, (300, IMG_SIZE), jnp.float32)
    out2 = full_connected_forward(x2, *params, tile_rows=128)
    jax.block_until_ready(out2)
    assert out2.shape == (300, CLASS_SIZE)
    assert jnp.allclose(out2, reference_forward_matched(x2, *params), atol=2e-3, rtol=2e-3), \
        "mismatch vs bf16-matched reference (tiled batch)"

    print("KERNEL_OK")
</pallas_src>

<mosaic_0001>
module attributes {stable_mosaic.version = 11 : i64} {
  func.func @_fc1_stats_kernel(%arg0: i32, %arg1: memref<32x400xbf16, #tpu.memory_space<vmem>>, %arg2: memref<400x128xbf16, #tpu.memory_space<vmem>>, %arg3: memref<1x128xf32, #tpu.memory_space<vmem>>, %arg4: memref<32x128xf32, #tpu.memory_space<vmem>>, %arg5: memref<1x128xf32, #tpu.memory_space<vmem>>, %arg6: memref<1x128xf32, #tpu.memory_space<vmem>>) attributes {dimension_semantics = [#tpu.dimension_semantics<arbitrary>], iteration_bounds = array<i64: 1>, scalar_prefetch = 0 : i64, scratch_operands = 0 : i64, tpu.core_type = #tpu.core_type<tc>, window_params = [{transform_indices = @transform_0, window_bounds = array<i64: 32, 400>}, {pipeline_mode = #tpu.pipeline_mode<synchronous>, transform_indices = @transform_1, window_bounds = array<i64: 400, 128>}, {pipeline_mode = #tpu.pipeline_mode<synchronous>, transform_indices = @transform_2, window_bounds = array<i64: 1, 128>}, {transform_indices = @transform_3, window_bounds = array<i64: 32, 128>}, {pipeline_mode = #tpu.pipeline_mode<synchronous>, transform_indices = @transform_4, window_bounds = array<i64: 1, 128>}, {pipeline_mode = #tpu.pipeline_mode<synchronous>, transform_indices = @transform_5, window_bounds = array<i64: 1, 128>}]} {
    %c0_i32 = arith.constant 0 : i32
    %0 = arith.cmpi eq, %arg0, %c0_i32 : i32
    %1 = arith.extui %0 : i1 to i32
    %c0_i32_0 = arith.constant 0 : i32
    %2 = arith.cmpi ne, %1, %c0_i32_0 : i32
    scf.if %2 {
      %cst_20 = arith.constant 0.000000e+00 : f32
      %31 = vector.broadcast %cst_20 : f32 to vector<1x128xf32>
      %c0_21 = arith.constant 0 : index
      %c0_22 = arith.constant 0 : index
      %32 = vector.load %arg5[%c0_21, %c0_22] : memref<1x128xf32, #tpu.memory_space<vmem>>, vector<1x128xf32>
      tpu.vector_store %arg5[%c0_21, %c0_22], %31 {strides = array<i32>} : memref<1x128xf32, #tpu.memory_space<vmem>>, vector<1x128xf32>,
      %cst_23 = arith.constant 0.000000e+00 : f32
      %33 = vector.broadcast %cst_23 : f32 to vector<1x128xf32>
      %c0_24 = arith.constant 0 : index
      %c0_25 = arith.constant 0 : index
      %34 = vector.load %arg6[%c0_24, %c0_25] : memref<1x128xf32, #tpu.memory_space<vmem>>, vector<1x128xf32>
      tpu.vector_store %arg6[%c0_24, %c0_25], %33 {strides = array<i32>} : memref<1x128xf32, #tpu.memory_space<vmem>>, vector<1x128xf32>,
    } else {
    }
    %c0 = arith.constant 0 : index
    %c0_1 = arith.constant 0 : index
    %3 = vector.load %arg1[%c0, %c0_1] : memref<32x400xbf16, #tpu.memory_space<vmem>>, vector<32x400xbf16>
    %c0_2 = arith.constant 0 : index
    %c0_3 = arith.constant 0 : index
    %4 = vector.load %arg2[%c0_2, %c0_3] : memref<400x128xbf16, #tpu.memory_space<vmem>>, vector<400x128xbf16>
    %cst = arith.constant dense<0.000000e+00> : vector<32x128xf32>
    %5 = tpu.matmul %3, %4, %cst {dimension_numbers = #tpu.dot_dimension_numbers<[1], [0], [0], [1], [0, 0, 1, 1], [], []>} : vector<32x400xbf16>, vector<400x128xbf16>, vector<32x128xf32> -> vector<32x128xf32>
    %c0_4 = arith.constant 0 : index
    %c0_5 = arith.constant 0 : index
    %6 = vector.load %arg3[%c0_4, %c0_5] : memref<1x128xf32, #tpu.memory_space<vmem>>, vector<1x128xf32>
    %7 = vector.broadcast %6 : vector<1x128xf32> to vector<32x128xf32>
    %8 = arith.addf %5, %7 : vector<32x128xf32>
    %c0_6 = arith.constant 0 : index
    %c0_7 = arith.constant 0 : index
    %9 = vector.load %arg4[%c0_6, %c0_7] : memref<32x128xf32, #tpu.memory_space<vmem>>, vector<32x128xf32>
    tpu.vector_store %arg4[%c0_6, %c0_7], %8 {strides = array<i32>} : memref<32x128xf32, #tpu.memory_space<vmem>>, vector<32x128xf32>,
    %c32_i32 = arith.constant 32 : i32
    %10 = arith.muli %arg0, %c32_i32 : i32
    %11 = tpu.iota {dimensions = array<i32: 0>} : vector<32x1xi32>
    %12 = vector.broadcast %10 : i32 to vector<32x1xi32>
    %13 = arith.addi %12, %11 : vector<32x1xi32>
    %c32_i32_8 = arith.constant 32 : i32
    %14 = vector.broadcast %c32_i32_8 : i32 to vector<32x1xi32>
    %15 = arith.cmpi slt, %13, %14 : vector<32x1xi32>
    %cst_9 = arith.constant 0.000000e+00 : f32
    %16 = vector.shape_cast %15 : vector<32x1xi1> to vector<32x1xi1>
    %17 = vector.broadcast %16 : vector<32x1xi1> to vector<32x128xi1>
    %18 = vector.broadcast %cst_9 : f32 to vector<32x128xf32>
    %19 = arith.select %17, %8, %18 : vector<32x128xi1>, vector<32x128xf32>
    %c0_10 = arith.constant 0 : index
    %c0_11 = arith.constant 0 : index
    %20 = vector.load %arg5[%c0_10, %c0_11] : memref<1x128xf32, #tpu.memory_space<vmem>>, vector<1x128xf32>
    %cst_12 = arith.constant dense<0.000000e+00> : vector<128xf32>
    %21 = vector.multi_reduction <add>, %19, %cst_12 [0] : vector<32x128xf32> to vector<128xf32>
    %22 = vector.shape_cast %21 : vector<128xf32> to vector<1x128xf32>
    %23 = arith.addf %20, %22 : vector<1x128xf32>
    %c0_13 = arith.constant 0 : index
    %c0_14 = arith.constant 0 : index
    %24 = vector.load %arg5[%c0_13, %c0_14] : memref<1x128xf32, #tpu.memory_space<vmem>>, vector<1x128xf32>
    tpu.vector_store %arg5[%c0_13, %c0_14], %23 {strides = array<i32>} : memref<1x128xf32, #tpu.memory_space<vmem>>, vector<1x128xf32>,
    %c0_15 = arith.constant 0 : index
    %c0_16 = arith.constant 0 : index
    %25 = vector.load %arg6[%c0_15, %c0_16] : memref<1x128xf32, #tpu.memory_space<vmem>>, vector<1x128xf32>
    %26 = arith.mulf %19, %19 : vector<32x128xf32>
    %cst_17 = arith.constant dense<0.000000e+00> : vector<128xf32>
    %27 = vector.multi_reduction <add>, %26, %cst_17 [0] : vector<32x128xf32> to vector<128xf32>
    %28 = vector.shape_cast %27 : vector<128xf32> to vector<1x128xf32>
    %29 = arith.addf %25, %28 : vector<1x128xf32>
    %c0_18 = arith.constant 0 : index
    %c0_19 = arith.constant 0 : index
    %30 = vector.load %arg6[%c0_18, %c0_19] : memref<1x128xf32, #tpu.memory_space<vmem>>, vector<1x128xf32>
    tpu.vector_store %arg6[%c0_18, %c0_19], %29 {strides = array<i32>} : memref<1x128xf32, #tpu.memory_space<vmem>>, vector<1x128xf32>,
    return
  }
  func.func @transform_0(%arg0: i32) -> (i32, i32) {
    %c0_i32 = arith.constant 0 : i32
    %c0_i32_0 = arith.constant 0 : i32
    return %arg0, %c0_i32 : i32, i32
  }
  func.func @transform_1(%arg0: i32) -> (i32, i32) {
    %c0_i32 = arith.constant 0 : i32
    %c0_i32_0 = arith.constant 0 : i32
    %c0_i32_1 = arith.constant 0 : i32
    return %c0_i32, %c0_i32_0 : i32, i32
  }
  func.func @transform_2(%arg0: i32) -> (i32, i32) {
    %c0_i32 = arith.constant 0 : i32
    %c0_i32_0 = arith.constant 0 : i32
    %c0_i32_1 = arith.constant 0 : i32
    return %c0_i32, %c0_i32_0 : i32, i32
  }
  func.func @transform_3(%arg0: i32) -> (i32, i32) {
    %c0_i32 = arith.constant 0 : i32
    %c0_i32_0 = arith.constant 0 : i32
    return %arg0, %c0_i32 : i32, i32
  }
  func.func @transform_4(%arg0: i32) -> (i32, i32) {
    %c0_i32 = arith.constant 0 : i32
    %c0_i32_0 = arith.constant 0 : i32
    %c0_i32_1 = arith.constant 0 : i32
    return %c0_i32, %c0_i32_0 : i32, i32
  }
  func.func @transform_5(%arg0: i32) -> (i32, i32) {
    %c0_i32 = arith.constant 0 : i32
    %c0_i32_0 = arith.constant 0 : i32
    %c0_i32_1 = arith.constant 0 : i32
    return %c0_i32, %c0_i32_0 : i32, i32
  }
}

</mosaic_0001>

<bundles_post_ra>
// kernel: tpu_custom_call.1
= control target key start
LH: loop header
LB: loop body
LE: loop exit
PB: predicated region body
PF: predicated region fallthrough
CT: control target
= control target key end

     0   :  { %11 = vsyncpa [#allocation3], 0  ;;  %s871_s0 = inlined_call_operand.hbm [shape: bf16[32,400], index: 0, kind: input, shape index: {}]   ;;  %s872_s1 = inlined_call_operand.hbm [shape: bf16[400,128], index: 1, kind: input, shape index: {}]   ;;  %s873_s2 = inlined_call_operand.vmem [shape: f32[1,128], index: 2, kind: input, shape index: {}]   ;;  %s874_s3 = inlined_call_operand.hbm [shape: f32[32,128], index: 3, kind: output, shape index: {0}]   ;;  %s875_s4 = inlined_call_operand.hbm [shape: f32[1,128], index: 4, kind: output, shape index: {1}]   ;;  %s876_s5 = inlined_call_operand.hbm [shape: f32[1,128], index: 5, kind: output, shape index: {2}]  }
   0x1   :  { %12 = vsyncpa [#allocation6], 0 }
   0x2   :  { %13 = vsyncpa [#allocation4], 0 }
   0x3   :  { %14 = vsyncpa [#allocation9], 0  ;;  %s19_s20 = sshll.u32 %s871_s0, 4  ;;  %s809_s21 = smov [#allocation2]   ;;  %s20_s20 = int_to_ptr.hbm [resolvable:$true] %s19_s20 }
   0x4   :  { %s21_s22 = sshll.u32 %s809_s21, 4  ;;  %s32_s25 = sshll.u32 %s872_s1, 4  ;;  %s22_s22 = int_to_ptr.vmem [resolvable:$true] %s21_s22  ;;  %s33_s25 = int_to_ptr.hbm [resolvable:$true] %s32_s25 }
   0x5   :  { %s810_s26 = smov 256   ;;  %s811_s27 = smov 16  }
   0x6   :  { %27 = dma.hbm_to_vmem [thread:$0]  %s20_s20, 1024, %s22_s22, [#allocation3], %s810_s26, %s810_s26, %s811_s27  }
   0x7   :  { %s812_s28 = smov [#allocation5]   ;;  %s813_s30 = smov 64  }
   0x8   :  { %s34_s29 = sshll.u32 %s812_s28, 4  ;;  %s814_s6 = smov 4   ;;  %s35_s29 = int_to_ptr.vmem [resolvable:$true] %s34_s29 }
   0x9   :  { %40 = dma.hbm_to_vmem [thread:$0]  %s33_s25, 3200, %s35_s29, [#allocation6], %s813_s30, %s813_s30, %s814_s6  }
   0xa   :  { %801 = dma.done.wait [#allocation3], 1024  }
   0xb   :  { %802 = vsyncadd [#allocation3], 4294966272 }
   0xc   :  { %803 = dma.done.wait [#allocation6], 3200  }
   0xd   :  { %804 = vsyncadd [#allocation6], 4294964096  ;;  %v650_v0 = vld [vmem:[#allocation5 + $0x38] sm:$0xff]  ;;  %v649_v3 = vld [vmem:[#allocation5 + $0x30] sm:$0xff]  ;;  %vm308_vm0 = vcmask 130048   ;;  %v815_v61 = vmov 0.0  }
   0xe   :  { %v658_v1 = vld [vmem:[#allocation5 + $0x78] sm:$0xff]  ;;  %315 = vmatpush.bf16.msra.mxu0 %v650_v0  ;;  %v657_v4 = vld [vmem:[#allocation5 + $0x70] sm:$0xff]  ;;  %v648_v6 = vld [vmem:[#allocation5 + $0x28] sm:$0xff]  ;;  %56 = vst [vmem:[#allocation8] sm:$0x1] %v815_v61  ;;  %s456_s10 = sshll.u32 %s874_s3, 4  ;;  %s457_s10 = int_to_ptr.hbm [resolvable:$true] %s456_s10 }
   0xf   :  { %v666_v2 = vld [vmem:[#allocation5 + $0xb8] sm:$0xff]  ;;  %334 = vmatpush.bf16.msra.mxu1 %v658_v1  ;;  %v665_v5 = vld [vmem:[#allocation5 + $0xb0] sm:$0xff]  ;;  %v656_v7 = vld [vmem:[#allocation5 + $0x68] sm:$0xff]  ;;  %57 = vst [vmem:[#allocation10] sm:$0x1] %v815_v61  ;;  %s817_s11 = smov 128  }
  0x10   :  { %353 = vmatpush.bf16.msra.mxu2 %v666_v2  ;;  %v667_v8 = vld [vmem:[#allocation5 + $0xc0] sm:$0xff]  ;;  %v664_v9 = vld [vmem:[#allocation5 + $0xa8] sm:$0xff]  ;;  %v513_v11 = vld [vmem:[#allocation2 + $0x18] sm:$0xf0]  ;;  %s818_s12 = smov 8   ;;  %s819_s3 = smov [#allocation8]  }
  0x11   :  { %v636_v10 = vld [vmem:[#allocation2 + $0xc] sm:$0xf]  ;;  %379 = vmatpush.bf16.msra.mxu3 %v667_v8  ;;  %v647_v13 = vld [vmem:[#allocation5 + $0x20] sm:$0xff]  ;;  %v646_v16 = vld [vmem:[#allocation5 + $0x18] sm:$0xff]  ;;  %s468_s13 = sshll.u32 %s819_s3, 4  ;;  %s470_s16 = sshll.u32 %s875_s4, 4  ;;  %s469_s13 = int_to_ptr.vmem [resolvable:$true] %s468_s13  ;;  %s471_s16 = int_to_ptr.hbm [resolvable:$true] %s470_s16 }
  0x12   :  { %316 = vmatpush.bf16.msra.mxu0 %v649_v3  ;;  %v516_v12 = vor.u32 %v636_v10, %v513_v11  ;;  %v655_v14 = vld [vmem:[#allocation5 + $0x60] sm:$0xff]  ;;  %v654_v17 = vld [vmem:[#allocation5 + $0x58] sm:$0xff]  ;;  %v645_v19 = vld [vmem:[#allocation5 + $0x10] sm:$0xff]  ;;  %s820_s17 = smov [#allocation10]   ;;  %s481_s21 = sshll.u32 %s876_s5, 4  ;;  %s482_s21 = int_to_ptr.hbm [resolvable:$true] %s481_s21 }
  0x13   :  { %335 = vmatpush.bf16.msra.mxu1 %v657_v4  ;;  %v663_v15 = vld [vmem:[#allocation5 + $0xa0] sm:$0xff]  ;;  %v662_v18 = vld [vmem:[#allocation5 + $0x98] sm:$0xff]  ;;  %v653_v20 = vld [vmem:[#allocation5 + $0x50] sm:$0xff]  ;;  %s479_s18 = sshll.u32 %s820_s17, 4  ;;  %s480_s18 = int_to_ptr.vmem [resolvable:$true] %s479_s18 }
  0x14   :  { %354 = vmatpush.bf16.msra.mxu2 %v665_v5  ;;  %633 = vmatmul.msk.bf16.vlgmr.msra.gmra.mxu3 %vm308_vm0, %v516_v12  ;;  %v661_v21 = vld [vmem:[#allocation5 + $0x90] sm:$0xff]  ;;  %v640_v22 = vld [vmem:[#allocation2 + $0x2c] sm:$0xf]  ;;  %v529_v23 = vld [vmem:[#allocation2 + $0x38] sm:$0xf0] }
  0x15   :  { %v644_v24 = vld [vmem:[#allocation5 + $0x8] sm:$0xff]  ;;  %v532_v27 = vor.u32 %v640_v22, %v529_v23  ;;  %v643_v28 = vld [vmem:[#allocation5] sm:$0xff]  ;;  %v637_v31 = vld [vmem:[#allocation2 + $0xc] sm:$0xf0] }
  0x16   :  { %317 = vmatpush.bf16.msra.mxu0 %v648_v6  ;;  %v652_v25 = vld [vmem:[#allocation5 + $0x48] sm:$0xff]  ;;  %v651_v29 = vld [vmem:[#allocation5 + $0x40] sm:$0xff]  ;;  %v505_v33 = vld [vmem:[#allocation2 + $0x10] sm:$0xf0] }
  0x17   :  { %336 = vmatpush.bf16.msra.mxu1 %v656_v7  ;;  %v660_v26 = vld [vmem:[#allocation5 + $0x88] sm:$0xff]  ;;  %v503_v30 = vld [vmem:[#allocation2] sm:$0xf]  ;;  %v635_v32 = vld [vmem:[#allocation2 + $0x4] sm:$0xf] }
  0x18   :  { %355 = vmatpush.bf16.msra.mxu2 %v664_v9  ;;  %v659_v34 = vld [vmem:[#allocation5 + $0x80] sm:$0xff]  ;;  %v511_v35 = vld [vmem:[#allocation2 + $0x8] sm:$0xf]  ;;  %v638_v36 = vld [vmem:[#allocation2 + $0x14] sm:$0xf0]  ;;  %v504_v37 = vor.u32 %v637_v31, %v503_v30  ;;  %v508_v38 = vor.u32 %v635_v32, %v505_v33 }
  0x19   :  { %v512_v39 = vor.u32 %v638_v36, %v511_v35  ;;  %v519_v40 = vld [vmem:[#allocation2 + $0x20] sm:$0xf]  ;;  %v641_v41 = vld [vmem:[#allocation2 + $0x2c] sm:$0xf0]  ;;  %v639_v42 = vld [vmem:[#allocation2 + $0x24] sm:$0xf] }
  0x1a   :  { %318 = vmatpush.bf16.msra.mxu0 %v647_v13  ;;  %v521_v43 = vld [vmem:[#allocation2 + $0x30] sm:$0xf0]  ;;  %v527_v44 = vld [vmem:[#allocation2 + $0x28] sm:$0xf]  ;;  %v642_v45 = vld [vmem:[#allocation2 + $0x34] sm:$0xf0]  ;;  %v520_v46 = vor.u32 %v641_v41, %v519_v40 }
  0x1b   :  { %337 = vmatpush.bf16.msra.mxu1 %v655_v14  ;;  %v524_v47 = vor.u32 %v639_v42, %v521_v43  ;;  %v528_v48 = vor.u32 %v642_v45, %v527_v44  ;;  %v680_v49 = vld [vmem:[%s873_s2] ss:$0 sm:$0xff]  ;;  %s816_s2 = smov [#allocation7]   ;;  %v434_v41 = vld [vmem:[#allocation10] sm:$0x1] }
  0x1c   :  { %356 = vmatpush.bf16.msra.mxu2 %v663_v15  ;;  %s454_s7 = sshll.u32 %s816_s2, 4  ;;  %s455_s7 = int_to_ptr.vmem [resolvable:$true] %s454_s7 }
  0x1e   :  { %319 = vmatpush.bf16.msra.mxu0 %v646_v16 }
  0x1f   :  { %338 = vmatpush.bf16.msra.mxu1 %v654_v17 }
  0x20   :  { %357 = vmatpush.bf16.msra.mxu2 %v662_v18 }
  0x22   :  { %320 = vmatpush.bf16.msra.mxu0 %v645_v19 }
  0x23   :  { %339 = vmatpush.bf16.msra.mxu1 %v653_v20 }
  0x24   :  { %358 = vmatpush.bf16.msra.mxu2 %v661_v21  ;;  %634 = vmatmul.msk.bf16.gmra.mxu3 %vm308_vm0, %v532_v27 }
  0x26   :  { %321 = vmatpush.bf16.msra.mxu0 %v644_v24 }
  0x27   :  { %340 = vmatpush.bf16.msra.mxu1 %v652_v25 }
  0x28   :  { %359 = vmatpush.bf16.msra.mxu2 %v660_v26 }
  0x2a   :  { %322 = vmatpush.bf16.msra.mxu0 %v643_v28 }
  0x2b   :  { %341 = vmatpush.bf16.msra.mxu1 %v651_v29 }
  0x2c   :  { %360 = vmatpush.bf16.msra.mxu2 %v659_v34 }
  0x2d   :  { %323 = vmatmul.bf16.vlgmr.msra.gmra.mxu0 %v504_v37 }
  0x2e   :  { %342 = vmatmul.bf16.vlgmr.msra.gmra.mxu1 %v508_v38  ;;  %v422_v38 = vld [vmem:[#allocation8] sm:$0x1] }
  0x2f   :  { %361 = vmatmul.bf16.vlgmr.msra.gmra.mxu2 %v512_v39 }
  0x3d   :  { %328 = vmatmul.bf16.gmra.mxu0 %v520_v46 }
  0x3e   :  { %347 = vmatmul.bf16.gmra.mxu1 %v524_v47 }
  0x3f   :  { %366 = vmatmul.bf16.gmra.mxu2 %v528_v48 }
  0x97   :  { %v381_v53 = vpop.f32.mrf.mxu3 }
  0x9f   :  { %v383_v62 = vpop.f32.mrf.mxu3 }
  0xa7   :  { %v386_v7 = vpop.f32.mrf.mxu3 }
  0xaa   :  { %v324_v50 = vpop.f32.mrf.mxu0 }
  0xab   :  { %v343_v51 = vpop.f32.mrf.mxu1  ;;  %v325_v52 = vadd.f32 %v680_v49, %v324_v50 }
  0xad   :  { %v344_v54 = vadd.f32 %v343_v51, %v325_v52 }
  0xaf   :  { %v388_v21 = vpop.f32.mrf.mxu3 }
  0xb2   :  { %v362_v55 = vpop.f32.mrf.mxu2  ;;  %v326_v57 = vpop.f32.mrf.mxu0 }
  0xb3   :  { %v363_v56 = vadd.f32 %v362_v55, %v344_v54  ;;  %v345_v58 = vpop.f32.mrf.mxu1  ;;  %v327_v60 = vadd.f32 %v680_v49, %v326_v57 }
  0xb5   :  { %v382_v59 = vadd.f32 %v381_v53, %v363_v56  ;;  %v346_v63 = vadd.f32 %v345_v58, %v327_v60 }
  0xb7   :  { %391 = vst [vmem:[#allocation7] sm:$0xff] %v382_v59  ;;  %v435_v17 = vmul.f32 %v382_v59, %v382_v59 }
  0xba   :  { %v364_v0 = vpop.f32.mrf.mxu2  ;;  %v329_v2 = vpop.f32.mrf.mxu0 }
  0xbb   :  { %v365_v1 = vadd.f32 %v364_v0, %v346_v63  ;;  %v330_v3 = vadd.f32 %v680_v49, %v329_v2  ;;  %v348_v5 = vpop.f32.mrf.mxu1 }
  0xbd   :  { %v384_v4 = vadd.f32 %v383_v62, %v365_v1  ;;  %v349_v6 = vadd.f32 %v348_v5, %v330_v3 }
  0xbf   :  { %392 = vst [vmem:[#allocation7 + $0x8] sm:$0xff] %v384_v4  ;;  %v436_v14 = vmul.f32 %v384_v4, %v384_v4  ;;  %v423_v18 = vadd.f32 %v384_v4, %v382_v59 }
  0xc1   :  { %v439_v22 = vadd.f32 %v436_v14, %v435_v17 }
  0xc2   :  { %v367_v8 = vpop.f32.mrf.mxu2  ;;  %v331_v10 = vpop.f32.mrf.mxu0 }
  0xc3   :  { %v368_v9 = vadd.f32 %v367_v8, %v349_v6  ;;  %v332_v12 = vadd.f32 %v680_v49, %v331_v10  ;;  %v350_v13 = vpop.f32.mrf.mxu1 }
  0xc5   :  { %v387_v11 = vadd.f32 %v386_v7, %v368_v9  ;;  %v351_v15 = vadd.f32 %v350_v13, %v332_v12 }
  0xc7   :  { %393 = vst [vmem:[#allocation7 + $0x10] sm:$0xff] %v387_v11  ;;  %v437_v19 = vmul.f32 %v387_v11, %v387_v11  ;;  %v424_v23 = vadd.f32 %v423_v18, %v387_v11 }
  0xc9   :  { %v440_v25 = vadd.f32 %v439_v22, %v437_v19 }
  0xca   :  { %v369_v16 = vpop.f32.mrf.mxu2 }
  0xcb   :  { %v370_v20 = vadd.f32 %v369_v16, %v351_v15 }
  0xcd   :  { %v389_v24 = vadd.f32 %v388_v21, %v370_v20 }
  0xcf   :  { %394 = vst [vmem:[#allocation7 + $0x18] sm:$0xff] %v389_v24  ;;  %v425_v26 = vadd.f32 %v424_v23, %v389_v24  ;;  %v438_v27 = vmul.f32 %v389_v24, %v389_v24 }
  0xd0   :  { %462 = dma.vmem_to_hbm [thread:$0]  %s455_s7, 512, %s457_s10, [#allocation4], %s817_s11, %s817_s11, %s818_s12  }
  0xd1   :  { %v426_v28 = vrot.slane %v425_v26, 4  ;;  %v441_v29 = vadd.f32 %v440_v25, %v438_v27 }
  0xd3   :  { %v427_v30 = vadd.f32 %v426_v28, %v425_v26  ;;  %v442_v31 = vrot.slane %v441_v29, 4 }
  0xd5   :  { %v428_v32 = vrot.slane %v427_v30, 2  ;;  %v443_v33 = vadd.f32 %v442_v31, %v441_v29 }
  0xd7   :  { %v429_v34 = vadd.f32 %v428_v32, %v427_v30  ;;  %v444_v35 = vrot.slane %v443_v33, 2 }
  0xd9   :  { %v445_v36 = vadd.f32 %v444_v35, %v443_v33  ;;  %v430_v37 = vrot.slane %v429_v34, 1 }
  0xdb   :  { %v431_v39 = vadd.f32 %v430_v37, %v429_v34  ;;  %v446_v40 = vrot.slane %v445_v36, 1 }
  0xdd   :  { %v432_v42 = vadd.f32 %v431_v39, %v422_v38  ;;  %v447_v43 = vadd.f32 %v446_v40, %v445_v36 }
  0xdf   :  { %433 = vst [vmem:[#allocation8] sm:$0x1] %v432_v42  ;;  %v448_v44 = vadd.f32 %v447_v43, %v434_v41 }
  0xe0   :  { %473 = dma.vmem_to_hbm [thread:$0]  %s469_s13, 16, %s471_s16, [#allocation9]  }
  0xe1   :  { %449 = vst [vmem:[#allocation10] sm:$0x1] %v448_v44 }
  0xe2   :  { %484 = dma.vmem_to_hbm [thread:$0]  %s480_s18, 16, %s482_s21, [#allocation9]  }
  0xe3   :  { %805 = dma.done.wait [#allocation4], 512  }
  0xe4   :  { %806 = vsyncadd [#allocation4], 4294966784 }
  0xe5   :  { %807 = dma.done.wait [#allocation9], 32  }
  0xe6   :  { %808 = vsyncadd [#allocation9], 4294967264 }
  0xe7   :  { %497 = vsyncpa [#allocation3], 1 }
  0xe8   :  { %498 = vsyncpa [#allocation6], 1 }
  0xe9   :  { %499 = vsyncpa [#allocation4], 1 }
  0xea   :  { %500 = vsyncpa [#allocation9], 1 }

</bundles_post_ra>
